<compile_context>
chip_gen: v5e
topology: v5e:2x2
jax: 0.10.0
libtpu: 0.0.40
codegen_flags: <defaults>
</compile_context>

<pallas_src>
import jax
import jax.numpy as jnp
from jax import lax
from jax.experimental import pallas as pl
from jax.experimental.pallas import tpu as pltpu


# ----------------------------------------------------------------------------
# Kernel 1: per batch-block main compute in (c, hw) layout.
# Outputs (bf16, lane-dense (n, c, hw)):
#   b_ref  = rgbt_c_h_w = A * sigmoid(qk*v) + sigmoid(qk*v)
#   pr_ref = S * rgb
#   pt_ref = sigmoid(S * t)
# where A = (W @ rgb) * (W @ t)  (== nn.Linear applied to the (hw, c) view)
# and   S = softmax_c(softmax_hw(A)).
# ----------------------------------------------------------------------------
def _mwi_main_kernel(w_ref, rgb_ref, t_ref, qk_ref, v_ref,
                     b_ref, pr_ref, pt_ref):
    nb, c, hw = rgb_ref.shape
    f32 = jnp.float32

    rgb = rgb_ref[...].astype(f32)                       # (nb, c, hw) f32
    t = t_ref[...].astype(f32)                           # (nb, c, hw) f32

    # nn.Linear(c, c, bias=False) on the (hw, c) view == W @ x in (c, hw).
    # Contraction dim is tiny (c), so the MXU is nowhere near the bottleneck:
    # keep the matmul in f32 for free accuracy.
    w_b = jnp.broadcast_to(w_ref[...].astype(f32), (nb, c, c))
    lin_rgb = jnp.einsum('bij,bjk->bik', w_b, rgb,
                         preferred_element_type=f32)     # (nb, c, hw)
    lin_t = jnp.einsum('bij,bjk->bik', w_b, t,
                       preferred_element_type=f32)       # (nb, c, hw)
    a = lin_rgb * lin_t                                  # rgbt in (c, hw)

    qkv = jax.nn.sigmoid(qk_ref[...].astype(f32) * v_ref[...].astype(f32))
    b_ref[...] = (a * qkv + qkv).astype(b_ref.dtype)     # rgbt_c_h_w

    # softmax over hw (lane axis)
    m = jnp.max(a, axis=-1, keepdims=True)
    e1 = jnp.exp(a - m)
    sm1 = e1 * pl.reciprocal(jnp.sum(e1, axis=-1, keepdims=True), approx=True)
    # softmax over c (sublane axis); sm1 is in [0, 1] so exp cannot overflow
    # and the max-subtraction is skipped.
    e2 = jnp.exp(sm1)
    s = e2 * pl.reciprocal(jnp.sum(e2, axis=1, keepdims=True), approx=True)

    pr_ref[...] = (s * rgb).astype(pr_ref.dtype)
    pt_ref[...] = jax.nn.sigmoid(s * t).astype(pt_ref.dtype)


# ----------------------------------------------------------------------------
# Kernel 2: final combine  out = Tp * (Rp + B)
# (Rp, Tp are the permuted tensors coming from torch's transpose+view.)
# ----------------------------------------------------------------------------
def _mwi_combine_kernel(b_ref, rp_ref, tp_ref, o_ref):
    f32 = jnp.float32
    o_ref[...] = (tp_ref[...].astype(f32) *
                  (rp_ref[...].astype(f32) + b_ref[...].astype(f32))
                  ).astype(o_ref.dtype)


def _pick_batch_block(n, c, hw):
    """Largest divisor of n that keeps the pipeline VMEM modest and, when
    possible, leaves >= 2 grid steps (megacore)."""
    # streamed bytes (double-buffered): 4 f32 inputs + 3 bf16 outputs,
    # plus ~12 f32-sized in-kernel temporaries per element.
    per_batch = (4 * 4 + 3 * 2) * 2 * c * hw + 12 * 4 * c * hw
    budget = 12 * 1024 * 1024
    nb = max(1, min(n, budget // max(per_batch, 1)))
    if n >= 2:
        nb = min(nb, max(1, n // 2))
    while n % nb:
        nb -= 1
    return nb


def mwi_forward(rgb, qk, v, t, W, *, inter_dtype=jnp.bfloat16,
                batch_block=None, vmem_limit_bytes=48 * 1024 * 1024):
    n, c, h, w = rgb.shape
    hw = h * w
    f32 = jnp.float32

    # (n, c, h, w) -> (n, c, hw): free metadata reshape (contiguous).
    rgb_f = rgb.reshape(n, c, hw)
    t_f = t.reshape(n, c, hw)
    qk_f = qk.reshape(n, c, hw)
    v_f = v.reshape(n, c, hw)

    nb = batch_block or _pick_batch_block(n, c, hw)
    assert n % nb == 0, "batch_block must divide the batch size"
    grid = (n // nb,)

    tile = pl.BlockSpec((nb, c, hw), lambda b: (b, 0, 0))
    w_spec = pl.BlockSpec((c, c), lambda b: (0, 0))
    cparams = pltpu.CompilerParams(
        dimension_semantics=("parallel",),
        vmem_limit_bytes=vmem_limit_bytes)

    b_out, p_rgb, p_t = pl.pallas_call(
        _mwi_main_kernel,
        out_shape=[jax.ShapeDtypeStruct((n, c, hw), inter_dtype)] * 3,
        grid_spec=pltpu.PrefetchScalarGridSpec(
            num_scalar_prefetch=0,
            grid=grid,
            in_specs=[w_spec, tile, tile, tile, tile],
            out_specs=[tile, tile, tile]),
        compiler_params=cparams,
    )(W, rgb_f, t_f, qk_f, v_f)

    # torch: transpose(1,2).contiguous().view(n, c, h, w) — a pure flat
    # re-layout of each (c, hw) slice.  Done as a single XLA
    # reshape-with-permutation per array on bf16 data (no arithmetic here).
    rp = lax.reshape(p_rgb, (n, c, hw), dimensions=(0, 2, 1))
    tp = lax.reshape(p_t, (n, c, hw), dimensions=(0, 2, 1))

    out = pl.pallas_call(
        _mwi_combine_kernel,
        out_shape=jax.ShapeDtypeStruct((n, c, hw), f32),
        grid_spec=pltpu.PrefetchScalarGridSpec(
            num_scalar_prefetch=0,
            grid=grid,
            in_specs=[tile, tile, tile],
            out_specs=tile),
        compiler_params=cparams,
    )(b_out, rp, tp)

    return out.reshape(n, c, h, w)


# ----------------------------------------------------------------------------
# Pure-JAX reference (mirrors the PyTorch forward literally), for validation.
# ----------------------------------------------------------------------------
def mwi_reference(rgb, qk, v, t, W):
    n, c, h, w = rgb.shape
    qkv = jax.nn.sigmoid(qk * v)
    rgb_c_hw = rgb.reshape(n, c, -1)
    t_c_hw = t.reshape(n, c, -1)
    # nn.Linear(c, c, bias=False): x @ W^T on (n, hw, c)
    rgb_hw_c = jnp.einsum('nip,ji->npj', rgb_c_hw, W)
    t_hw_c = jnp.einsum('nip,ji->npj', t_c_hw, W)
    rgbt_hw_c = rgb_hw_c * t_hw_c
    rgbt_c_hw = jnp.transpose(rgbt_hw_c, (0, 2, 1))
    rgbt_c_h_w = rgbt_c_hw.reshape(n, c, h, w) * qkv + qkv
    s = jax.nn.softmax(rgbt_c_hw, axis=2)
    s = jax.nn.softmax(s, axis=1)
    r = jnp.transpose(s * rgb_c_hw, (0, 2, 1)).reshape(n, c, h, w) + rgbt_c_h_w
    tt = jax.nn.sigmoid(
        jnp.transpose(s * t_c_hw, (0, 2, 1))).reshape(n, c, h, w) * r
    return tt


if __name__ == "__main__":
    # small, shape-consistent example: n=2, c=8, h=w=16  (h*w = 256, lane-dense)
    n, c, h, w = 2, 8, 16, 16
    key = jax.random.PRNGKey(0)
    k_rgb, k_qk, k_v, k_t, k_w = jax.random.split(key, 5)

    rgb = jax.random.normal(k_rgb, (n, c, h, w), dtype=jnp.float32)
    qk = jax.random.normal(k_qk, (n, c, h, w), dtype=jnp.float32)
    v = jax.random.normal(k_v, (n, c, h, w), dtype=jnp.float32)
    t = jax.random.normal(k_t, (n, c, h, w), dtype=jnp.float32)

    # deterministic nn.Linear(c, c, bias=False)-style init: U(-1/sqrt(c), 1/sqrt(c))
    bound = 1.0 / (c ** 0.5)
    W = jax.random.uniform(k_w, (c, c), minval=-bound, maxval=bound,
                           dtype=jnp.float32)

    out = jax.jit(mwi_forward)(rgb, qk, v, t, W)
    out = jax.block_until_ready(out)
    assert out.shape == (n, c, h, w)
    assert out.dtype == jnp.float32

    # Full-f32 reference.  Kernel error sources: bf16 storage of the three
    # intermediates and the approximate (EUP) softmax reciprocals; everything
    # else (inputs, matmul, softmax stats) is f32 in the kernel.
    ref = mwi_reference(rgb, qk, v, t, W)
    max_err = float(jnp.max(jnp.abs(out - ref)))
    assert jnp.allclose(out, ref, atol=3e-2, rtol=3e-2), \
        f"mismatch vs reference: {max_err}"

    print("KERNEL_OK")
</pallas_src>

<mosaic_0001>
module attributes {stable_mosaic.version = 11 : i64} {
  func.func @_mwi_main_kernel(%arg0: i32, %arg1: memref<8x8xf32, #tpu.memory_space<vmem>>, %arg2: memref<1x8x256xf32, #tpu.memory_space<vmem>>, %arg3: memref<1x8x256xf32, #tpu.memory_space<vmem>>, %arg4: memref<1x8x256xf32, #tpu.memory_space<vmem>>, %arg5: memref<1x8x256xf32, #tpu.memory_space<vmem>>, %arg6: memref<1x8x256xbf16, #tpu.memory_space<vmem>>, %arg7: memref<1x8x256xbf16, #tpu.memory_space<vmem>>, %arg8: memref<1x8x256xbf16, #tpu.memory_space<vmem>>) attributes {dimension_semantics = [#tpu.dimension_semantics<parallel>], iteration_bounds = array<i64: 2>, scalar_prefetch = 0 : i64, scratch_operands = 0 : i64, tpu.core_type = #tpu.core_type<tc>, window_params = [{pipeline_mode = #tpu.pipeline_mode<synchronous>, transform_indices = @transform_0, window_bounds = array<i64: 8, 8>}, {transform_indices = @transform_1, window_bounds = array<i64: 1, 8, 256>}, {transform_indices = @transform_2, window_bounds = array<i64: 1, 8, 256>}, {transform_indices = @transform_3, window_bounds = array<i64: 1, 8, 256>}, {transform_indices = @transform_4, window_bounds = array<i64: 1, 8, 256>}, {transform_indices = @transform_5, window_bounds = array<i64: 1, 8, 256>}, {transform_indices = @transform_6, window_bounds = array<i64: 1, 8, 256>}, {transform_indices = @transform_7, window_bounds = array<i64: 1, 8, 256>}]} {
    %c0 = arith.constant 0 : index
    %c0_0 = arith.constant 0 : index
    %c0_1 = arith.constant 0 : index
    %0 = vector.load %arg2[%c0, %c0_0, %c0_1] : memref<1x8x256xf32, #tpu.memory_space<vmem>>, vector<1x8x256xf32>
    %c0_2 = arith.constant 0 : index
    %c0_3 = arith.constant 0 : index
    %c0_4 = arith.constant 0 : index
    %1 = vector.load %arg3[%c0_2, %c0_3, %c0_4] : memref<1x8x256xf32, #tpu.memory_space<vmem>>, vector<1x8x256xf32>
    %c0_5 = arith.constant 0 : index
    %c0_6 = arith.constant 0 : index
    %2 = vector.load %arg1[%c0_5, %c0_6] : memref<8x8xf32, #tpu.memory_space<vmem>>, vector<8x8xf32>
    %3 = vector.shape_cast %2 : vector<8x8xf32> to vector<1x8x8xf32>
    "tpu.trace_start"() <{level = 10 : i32, message = "bij,bjk->bik"}> : () -> ()
    %cst = arith.constant dense<0.000000e+00> : vector<1x8x256xf32>
    %4 = tpu.matmul %3, %0, %cst {dimension_numbers = #tpu.dot_dimension_numbers<[2], [1], [1], [2], [0, 0, 0, 1, 1, 2], [0], [0]>} : vector<1x8x8xf32>, vector<1x8x256xf32>, vector<1x8x256xf32> -> vector<1x8x256xf32>
    %cst_7 = arith.constant dense<0.000000e+00> : vector<1x8x256xf32>
    %5 = tpu.matmul %3, %1, %cst_7 {dimension_numbers = #tpu.dot_dimension_numbers<[2], [1], [1], [2], [0, 0, 0, 1, 1, 2], [0], [0]>} : vector<1x8x8xf32>, vector<1x8x256xf32>, vector<1x8x256xf32> -> vector<1x8x256xf32>
    "tpu.trace_stop"() : () -> ()
    %6 = arith.mulf %4, %5 : vector<1x8x256xf32>
    %c0_8 = arith.constant 0 : index
    %c0_9 = arith.constant 0 : index
    %c0_10 = arith.constant 0 : index
    %7 = vector.load %arg4[%c0_8, %c0_9, %c0_10] : memref<1x8x256xf32, #tpu.memory_space<vmem>>, vector<1x8x256xf32>
    %c0_11 = arith.constant 0 : index
    %c0_12 = arith.constant 0 : index
    %c0_13 = arith.constant 0 : index
    %8 = vector.load %arg5[%c0_11, %c0_12, %c0_13] : memref<1x8x256xf32, #tpu.memory_space<vmem>>, vector<1x8x256xf32>
    %9 = arith.mulf %7, %8 : vector<1x8x256xf32>
    %10 = arith.negf %9 : vector<1x8x256xf32>
    %11 = math.exp %10 : vector<1x8x256xf32>
    %cst_14 = arith.constant 1.000000e+00 : f32
    %12 = vector.broadcast %cst_14 : f32 to vector<1x8x256xf32>
    %13 = arith.addf %12, %11 : vector<1x8x256xf32>
    %14 = arith.divf %12, %13 : vector<1x8x256xf32>
    %15 = arith.mulf %6, %14 : vector<1x8x256xf32>
    %16 = arith.addf %15, %14 : vector<1x8x256xf32>
    %17 = arith.truncf %16 : vector<1x8x256xf32> to vector<1x8x256xbf16>
    %c0_15 = arith.constant 0 : index
    %c0_16 = arith.constant 0 : index
    %c0_17 = arith.constant 0 : index
    %18 = vector.load %arg6[%c0_15, %c0_16, %c0_17] : memref<1x8x256xbf16, #tpu.memory_space<vmem>>, vector<1x8x256xbf16>
    tpu.vector_store %arg6[%c0_15, %c0_16, %c0_17], %17 {strides = array<i32>} : memref<1x8x256xbf16, #tpu.memory_space<vmem>>, vector<1x8x256xbf16>,
    %cst_18 = arith.constant dense<0xFF800000> : vector<1x8xf32>
    %19 = vector.multi_reduction <maximumf>, %6, %cst_18 [2] : vector<1x8x256xf32> to vector<1x8xf32>
    %20 = vector.shape_cast %19 : vector<1x8xf32> to vector<1x8x1xf32>
    %21 = vector.broadcast %20 : vector<1x8x1xf32> to vector<1x8x256xf32>
    %22 = arith.subf %6, %21 : vector<1x8x256xf32>
    %23 = math.exp %22 : vector<1x8x256xf32>
    %cst_19 = arith.constant dense<0.000000e+00> : vector<1x8xf32>
    %24 = vector.multi_reduction <add>, %23, %cst_19 [2] : vector<1x8x256xf32> to vector<1x8xf32>
    %25 = vector.shape_cast %24 : vector<1x8xf32> to vector<1x8x1xf32>
    %26 = tpu.reciprocal %25 {approx = true} : vector<1x8x1xf32> -> vector<1x8x1xf32>
    %27 = vector.broadcast %26 : vector<1x8x1xf32> to vector<1x8x256xf32>
    %28 = arith.mulf %23, %27 : vector<1x8x256xf32>
    %29 = math.exp %28 : vector<1x8x256xf32>
    %cst_20 = arith.constant dense<0.000000e+00> : vector<1x256xf32>
    %30 = vector.multi_reduction <add>, %29, %cst_20 [1] : vector<1x8x256xf32> to vector<1x256xf32>
    %31 = vector.shape_cast %30 : vector<1x256xf32> to vector<1x1x256xf32>
    %32 = tpu.reciprocal %31 {approx = true} : vector<1x1x256xf32> -> vector<1x1x256xf32>
    %33 = vector.broadcast %32 : vector<1x1x256xf32> to vector<1x8x256xf32>
    %34 = arith.mulf %29, %33 : vector<1x8x256xf32>
    %35 = arith.mulf %34, %0 : vector<1x8x256xf32>
    %36 = arith.truncf %35 : vector<1x8x256xf32> to vector<1x8x256xbf16>
    %c0_21 = arith.constant 0 : index
    %c0_22 = arith.constant 0 : index
    %c0_23 = arith.constant 0 : index
    %37 = vector.load %arg7[%c0_21, %c0_22, %c0_23] : memref<1x8x256xbf16, #tpu.memory_space<vmem>>, vector<1x8x256xbf16>
    tpu.vector_store %arg7[%c0_21, %c0_22, %c0_23], %36 {strides = array<i32>} : memref<1x8x256xbf16, #tpu.memory_space<vmem>>, vector<1x8x256xbf16>,
    %38 = arith.mulf %34, %1 : vector<1x8x256xf32>
    %39 = arith.negf %38 : vector<1x8x256xf32>
    %40 = math.exp %39 : vector<1x8x256xf32>
    %cst_24 = arith.constant 1.000000e+00 : f32
    %41 = vector.broadcast %cst_24 : f32 to vector<1x8x256xf32>
    %42 = arith.addf %41, %40 : vector<1x8x256xf32>
    %43 = arith.divf %41, %42 : vector<1x8x256xf32>
    %44 = arith.truncf %43 : vector<1x8x256xf32> to vector<1x8x256xbf16>
    %c0_25 = arith.constant 0 : index
    %c0_26 = arith.constant 0 : index
    %c0_27 = arith.constant 0 : index
    %45 = vector.load %arg8[%c0_25, %c0_26, %c0_27] : memref<1x8x256xbf16, #tpu.memory_space<vmem>>, vector<1x8x256xbf16>
    tpu.vector_store %arg8[%c0_25, %c0_26, %c0_27], %44 {strides = array<i32>} : memref<1x8x256xbf16, #tpu.memory_space<vmem>>, vector<1x8x256xbf16>,
    return
  }
  func.func @transform_0(%arg0: i32) -> (i32, i32) {
    %c0_i32 = arith.constant 0 : i32
    %c0_i32_0 = arith.constant 0 : i32
    %c0_i32_1 = arith.constant 0 : i32
    return %c0_i32, %c0_i32_0 : i32, i32
  }
  func.func @transform_1(%arg0: i32) -> (i32, i32, i32) {
    %c0_i32 = arith.constant 0 : i32
    %c0_i32_0 = arith.constant 0 : i32
    %c0_i32_1 = arith.constant 0 : i32
    return %arg0, %c0_i32, %c0_i32_0 : i32, i32, i32
  }
  func.func @transform_2(%arg0: i32) -> (i32, i32, i32) {
    %c0_i32 = arith.constant 0 : i32
    %c0_i32_0 = arith.constant 0 : i32
    %c0_i32_1 = arith.constant 0 : i32
    return %arg0, %c0_i32, %c0_i32_0 : i32, i32, i32
  }
  func.func @transform_3(%arg0: i32) -> (i32, i32, i32) {
    %c0_i32 = arith.constant 0 : i32
    %c0_i32_0 = arith.constant 0 : i32
    %c0_i32_1 = arith.constant 0 : i32
    return %arg0, %c0_i32, %c0_i32_0 : i32, i32, i32
  }
  func.func @transform_4(%arg0: i32) -> (i32, i32, i32) {
    %c0_i32 = arith.constant 0 : i32
    %c0_i32_0 = arith.constant 0 : i32
    %c0_i32_1 = arith.constant 0 : i32
    return %arg0, %c0_i32, %c0_i32_0 : i32, i32, i32
  }
  func.func @transform_5(%arg0: i32) -> (i32, i32, i32) {
    %c0_i32 = arith.constant 0 : i32
    %c0_i32_0 = arith.constant 0 : i32
    %c0_i32_1 = arith.constant 0 : i32
    return %arg0, %c0_i32, %c0_i32_0 : i32, i32, i32
  }
  func.func @transform_6(%arg0: i32) -> (i32, i32, i32) {
    %c0_i32 = arith.constant 0 : i32
    %c0_i32_0 = arith.constant 0 : i32
    %c0_i32_1 = arith.constant 0 : i32
    return %arg0, %c0_i32, %c0_i32_0 : i32, i32, i32
  }
  func.func @transform_7(%arg0: i32) -> (i32, i32, i32) {
    %c0_i32 = arith.constant 0 : i32
    %c0_i32_0 = arith.constant 0 : i32
    %c0_i32_1 = arith.constant 0 : i32
    return %arg0, %c0_i32, %c0_i32_0 : i32, i32, i32
  }
}

module attributes {stable_mosaic.version = 11 : i64} {
  func.func @_mwi_combine_kernel(%arg0: i32, %arg1: memref<1x8x256xbf16, #tpu.memory_space<vmem>>, %arg2: memref<1x8x256xbf16, #tpu.memory_space<vmem>>, %arg3: memref<1x8x256xbf16, #tpu.memory_space<vmem>>, %arg4: memref<1x8x256xf32, #tpu.memory_space<vmem>>) attributes {dimension_semantics = [#tpu.dimension_semantics<parallel>], iteration_bounds = array<i64: 2>, scalar_prefetch = 0 : i64, scratch_operands = 0 : i64, tpu.core_type = #tpu.core_type<tc>, window_params = [{transform_indices = @transform_0, window_bounds = array<i64: 1, 8, 256>}, {transform_indices = @transform_1, window_bounds = array<i64: 1, 8, 256>}, {transform_indices = @transform_2, window_bounds = array<i64: 1, 8, 256>}, {transform_indices = @transform_3, window_bounds = array<i64: 1, 8, 256>}]} {
    %c0 = arith.constant 0 : index
    %c0_0 = arith.constant 0 : index
    %c0_1 = arith.constant 0 : index
    %0 = vector.load %arg3[%c0, %c0_0, %c0_1] : memref<1x8x256xbf16, #tpu.memory_space<vmem>>, vector<1x8x256xbf16>
    %1 = arith.extf %0 : vector<1x8x256xbf16> to vector<1x8x256xf32>
    %c0_2 = arith.constant 0 : index
    %c0_3 = arith.constant 0 : index
    %c0_4 = arith.constant 0 : index
    %2 = vector.load %arg2[%c0_2, %c0_3, %c0_4] : memref<1x8x256xbf16, #tpu.memory_space<vmem>>, vector<1x8x256xbf16>
    %3 = arith.extf %2 : vector<1x8x256xbf16> to vector<1x8x256xf32>
    %c0_5 = arith.constant 0 : index
    %c0_6 = arith.constant 0 : index
    %c0_7 = arith.constant 0 : index
    %4 = vector.load %arg1[%c0_5, %c0_6, %c0_7] : memref<1x8x256xbf16, #tpu.memory_space<vmem>>, vector<1x8x256xbf16>
    %5 = arith.extf %4 : vector<1x8x256xbf16> to vector<1x8x256xf32>
    %6 = arith.addf %3, %5 : vector<1x8x256xf32>
    %7 = arith.mulf %1, %6 : vector<1x8x256xf32>
    %c0_8 = arith.constant 0 : index
    %c0_9 = arith.constant 0 : index
    %c0_10 = arith.constant 0 : index
    %8 = vector.load %arg4[%c0_8, %c0_9, %c0_10] : memref<1x8x256xf32, #tpu.memory_space<vmem>>, vector<1x8x256xf32>
    tpu.vector_store %arg4[%c0_8, %c0_9, %c0_10], %7 {strides = array<i32>} : memref<1x8x256xf32, #tpu.memory_space<vmem>>, vector<1x8x256xf32>,
    return
  }
  func.func @transform_0(%arg0: i32) -> (i32, i32, i32) {
    %c0_i32 = arith.constant 0 : i32
    %c0_i32_0 = arith.constant 0 : i32
    %c0_i32_1 = arith.constant 0 : i32
    return %arg0, %c0_i32, %c0_i32_0 : i32, i32, i32
  }
  func.func @transform_1(%arg0: i32) -> (i32, i32, i32) {
    %c0_i32 = arith.constant 0 : i32
    %c0_i32_0 = arith.constant 0 : i32
    %c0_i32_1 = arith.constant 0 : i32
    return %arg0, %c0_i32, %c0_i32_0 : i32, i32, i32
  }
  func.func @transform_2(%arg0: i32) -> (i32, i32, i32) {
    %c0_i32 = arith.constant 0 : i32
    %c0_i32_0 = arith.constant 0 : i32
    %c0_i32_1 = arith.constant 0 : i32
    return %arg0, %c0_i32, %c0_i32_0 : i32, i32, i32
  }
  func.func @transform_3(%arg0: i32) -> (i32, i32, i32) {
    %c0_i32 = arith.constant 0 : i32
    %c0_i32_0 = arith.constant 0 : i32
    %c0_i32_1 = arith.constant 0 : i32
    return %arg0, %c0_i32, %c0_i32_0 : i32, i32, i32
  }
}

</mosaic_0001>

<bundles_post_ra>
// kernel: mwi_forward.2
= control target key start
LH: loop header
LB: loop body
LE: loop exit
PB: predicated region body
PF: predicated region fallthrough
CT: control target
= control target key end

     0   :  { %s865_s24 = smov 0   ;;  %s925_s0 = inlined_call_operand.vmem [shape: f32[8,8], index: 0, kind: input, shape index: {}]   ;;  %s926_s1 = inlined_call_operand.vmem [shape: f32[2,8,256], index: 1, kind: input, shape index: {}]   ;;  %s927_s2 = inlined_call_operand.vmem [shape: f32[2,8,256], index: 2, kind: input, shape index: {}]   ;;  %s928_s3 = inlined_call_operand.vmem [shape: f32[2,8,256], index: 3, kind: input, shape index: {}]   ;;  %s929_s4 = inlined_call_operand.vmem [shape: f32[2,8,256], index: 4, kind: input, shape index: {}]   ;;  %s930_s5 = inlined_call_operand.vmem [shape: bf16[2,8,256], index: 5, kind: output, shape index: {0}]   ;;  %s931_s6 = inlined_call_operand.vmem [shape: bf16[2,8,256], index: 6, kind: output, shape index: {1}]   ;;  %s932_s7 = inlined_call_operand.vmem [shape: bf16[2,8,256], index: 7, kind: output, shape index: {2}]  }
   0x1 LB: > { %s743_s25 = sadd.s32 4294967295, %s823_s24   ;;  %p747_p0 = scmp.ge.s32.totalorder %s823_s24, 1  ;;  %s823_s24 = sphi %s865_s24, %s18_s24  }
   0x2   : > { %p272_p1 = scmp.lt.s32.totalorder %s823_s24, 3 }
   0x4   : > { %p273_p2 = pnand %p747_p0, %p272_p1 }
   0x5   : > { %p329_p3 = scmp.lt.s32.totalorder (!%p273_p2), %s743_s25, 1 }
   0x6   : > { %276 = sbr.rel (%p273_p2) target bundleno = 471 (0x1d7), region = 40 }
   0xb   : > { %s934_s25 = smov (!%p329_p3, %s743_s25), 1  ;;  %v368_v0 = vld [vmem:[%s925_s0] sm:$0xff]  ;;  %vm369_vm0 = vcmask 64512  }
   0xc   : > { %s772_s26 = sshll.u32 %s934_s25, 4  ;;  %s904_s18 = sshll.u32 %s934_s25, 3 }
   0xd   : > { %s338_s29 = scalar_lea.vmem %s927_s2, %s772_s26  ;;  %s333_s11 = scalar_lea.vmem %s926_s1, %s772_s26 }
   0xe   : > { %v882_v1 = vld [vmem:[%s338_s29] sm:$0xff]  ;;  %v885_v2 = vld [vmem:[%s338_s29 + $0x8] sm:$0xff]  ;;  %s343_s14 = scalar_lea.vmem %s928_s3, %s772_s26  ;;  %s348_s17 = scalar_lea.vmem %s929_s4, %s772_s26 }
   0xf   : > { %428 = vmatpush.msra.mxu2 %v882_v1  ;;  %448 = vmatpush.msra.mxu3 %v885_v2  ;;  %v891_v3 = vld [vmem:[%s333_s11] sm:$0xff]  ;;  %v893_v4 = vld [vmem:[%s333_s11 + $0x8] sm:$0xff]  ;;  %s353_s21 = scalar_lea.vmem %s930_s5, %s904_s18  ;;  %s358_s25 = scalar_lea.vmem %s931_s6, %s904_s18 }
  0x10   : > { %764 = vmatmul.msk.f32.vlgmr.msra.gmra.mxu2 %vm369_vm0, %v368_v0  ;;  %765 = vmatmul.msk.f32.vlgmr.msra.gmra.mxu3 %vm369_vm0, %v368_v0  ;;  %v455_v5 = vld [vmem:[%s343_s14] sm:$0xff]  ;;  %v456_v7 = vld [vmem:[%s343_s14 + $0x8] sm:$0xff]  ;;  %s363_s28 = scalar_lea.vmem %s932_s7, %s904_s18 }
  0x11   : > { %388 = vmatpush.msra.mxu0 %v891_v3  ;;  %408 = vmatpush.msra.mxu1 %v893_v4  ;;  %v457_v6 = vld [vmem:[%s348_s17] sm:$0xff]  ;;  %v458_v8 = vld [vmem:[%s348_s17 + $0x8] sm:$0xff] }
  0x12   : > { %762 = vmatmul.msk.f32.vlgmr.msra.gmra.mxu0 %vm369_vm0, %v368_v0  ;;  %763 = vmatmul.msk.f32.vlgmr.msra.gmra.mxu1 %vm369_vm0, %v368_v0  ;;  %v459_v9 = vmul.f32 %v457_v6, %v455_v5  ;;  %v460_v10 = vmul.f32 %v458_v8, %v456_v7 }
  0x14   : > { %v766_v11 = vmul.f32 -1.442695, %v459_v9  ;;  %v767_v12 = vmul.f32 -1.442695, %v460_v10 }
  0x16   : > { %787 = vpow2.f32 %v766_v11 }
  0x17   : > { %789 = vpow2.f32 %v767_v12 }
  0x1c   : > { %v788_v13 = vpop.eup %787 }
  0x1d   : > { %v790_v14 = vpop.eup %789  ;;  %v467_v15 = vadd.f32 1.0, %v788_v13 }
  0x1e   : > { %v468_v16 = vadd.f32 1.0, %v790_v14 }
  0x1f   : > { %791 = vrcp.f32 %v467_v15  ;;  %vm474_vm1 = vweird.f32 %v467_v15  ;;  %v480_v25 = vand.u32 2147483648, %v467_v15  ;;  %v478_v27 = vand.u32 2147483647, %v467_v15 }
  0x20   : > { %793 = vrcp.f32 %v468_v16  ;;  %vm489_vm3 = vweird.f32 %v468_v16  ;;  %v495_v28 = vand.u32 2147483648, %v468_v16  ;;  %v493_v30 = vand.u32 2147483647, %v468_v16 }
  0x21   : > { %v481_v31 = vor.u32 1.1754944e-38, %v480_v25  ;;  %vm479_vm7 = vcmp.eq.f32.partialorder %v478_v27, 8.507059e+37 }
  0x22   : > { %v496_v33 = vor.u32 1.1754944e-38, %v495_v28  ;;  %vm494_vm8 = vcmp.eq.f32.partialorder %v493_v30, 8.507059e+37 }
  0x25   : > { %v792_v17 = vpop.eup %791 }
  0x26   : > { %v794_v18 = vpop.eup %793  ;;  %v470_v19 = vmul.f32 %v792_v17, %v467_v15  ;;  %vm475_vm2 = vweird.f32 %v792_v17 }
  0x27   : > { %v485_v20 = vmul.f32 %v794_v18, %v468_v16  ;;  %vm490_vm4 = vweird.f32 %v794_v18  ;;  %vm476_vm5 = vmor %vm474_vm1, %vm475_vm2 }
  0x28   : > { %v471_v21 = vsub.f32 1.0, %v470_v19  ;;  %vm491_vm6 = vmor %vm489_vm3, %vm490_vm4 }
  0x29   : > { %v486_v22 = vsub.f32 1.0, %v485_v20 }
  0x2a   : > { %v472_v23 = vmul.f32 %v792_v17, %v471_v21 }
  0x2b   : > { %v487_v24 = vmul.f32 %v794_v18, %v486_v22 }
  0x2c   : > { %v473_v26 = vadd.f32 %v792_v17, %v472_v23 }
  0x2d   : > { %v488_v29 = vadd.f32 %v794_v18, %v487_v24 }
  0x2e   : > { %v477_v32 = vsel %vm476_vm5, %v792_v17, %v473_v26 }
  0x2f   : > { %v492_v35 = vsel %vm491_vm6, %v794_v18, %v488_v29  ;;  %v482_v38 = vsel %vm479_vm7, %v481_v31, %v477_v32 }
  0x30   : > { %v497_v41 = vsel %vm494_vm8, %v496_v33, %v492_v35 }
  0x8f   : > { %v390_v34 = vpop.f32.mrf.mxu0  ;;  %v410_v36 = vpop.f32.mrf.mxu1 }
  0x93   : > { %v430_v37 = vpop.f32.mrf.mxu2  ;;  %v450_v40 = vpop.f32.mrf.mxu3 }
  0x94   : > { %v453_v39 = vmul.f32 %v430_v37, %v390_v34  ;;  %v454_v42 = vmul.f32 %v450_v40, %v410_v36 }
  0x96   : > { %v499_v43 = vmul.f32 %v482_v38, %v453_v39  ;;  %v500_v44 = vmul.f32 %v497_v41, %v454_v42  ;;  %v505_v45 = vmax.f32 %v453_v39, %v454_v42 }
  0x98   : > { %v501_v46 = vadd.f32 %v499_v43, %v482_v38  ;;  %v502_v47 = vadd.f32 %v500_v44, %v497_v41  ;;  %506 = vmax.xlane.f32.xlu0 %v505_v45 }
  0x9a   : > { %v503_v48 = vpack.c.bf16 %v502_v47, %v501_v46 }
  0x9c   : > { %504 = vst [vmem:[%s353_s21] sm:$0xff] %v503_v48 }
 0x10b   : > { %v507_v49 = vpop.xlane.xlu0 %506 }
 0x10c   : > { %v508_v50 = vsub.f32 %v453_v39, %v507_v49  ;;  %v509_v51 = vsub.f32 %v454_v42, %v507_v49 }
 0x10e   : > { %v510_v52 = vmul.f32 1.442695, %v508_v50  ;;  %v512_v53 = vmul.f32 1.442695, %v509_v51 }
 0x110   : > { %795 = vpow2.f32 %v510_v52 }
 0x111   : > { %797 = vpow2.f32 %v512_v53 }
 0x116   : > { %v796_v54 = vpop.eup %795 }
 0x117   : > { %v798_v55 = vpop.eup %797 }
 0x118   : > { %v514_v56 = vadd.f32 %v798_v55, %v796_v54 }
 0x11a   : > { %515 = vadd.xlane.f32.xlu0 %v514_v56 }
 0x18d   : > { %v516_v57 = vpop.xlane.xlu0 %515 }
 0x18e   : > { %799 = vrcp.f32 %v516_v57 }
 0x194   : > { %v800_v58 = vpop.eup %799 }
 0x195   : > { %v518_v59 = vmul.f32 %v800_v58, %v796_v54  ;;  %v519_v60 = vmul.f32 %v800_v58, %v798_v55 }
 0x197   : > { %v520_v61 = vmul.f32 1.442695, %v518_v59  ;;  %v522_v62 = vmul.f32 1.442695, %v519_v60 }
 0x199   : > { %801 = vpow2.f32 %v520_v61 }
 0x19a   : > { %803 = vpow2.f32 %v522_v62 }
 0x19f   : > { %v802_v63 = vpop.eup %801 }
 0x1a0   : > { %v804_v0 = vpop.eup %803  ;;  %v524_v5 = vrot.slane %v802_v63, 4 }
 0x1a1   : > { %v530_v6 = vrot.slane %v804_v0, 4 }
 0x1a2   : > { %v525_v7 = vadd.f32 %v802_v63, %v524_v5 }
 0x1a3   : > { %v531_v8 = vadd.f32 %v804_v0, %v530_v6 }
 0x1a4   : > { %v526_v9 = vrot.slane %v525_v7, 2 }
 0x1a5   : > { %v532_v10 = vrot.slane %v531_v8, 2 }
 0x1a6   : > { %v527_v11 = vadd.f32 %v526_v9, %v525_v7 }
 0x1a7   : > { %v533_v12 = vadd.f32 %v532_v10, %v531_v8 }
 0x1a8   : > { %v528_v13 = vrot.slane %v527_v11, 1 }
 0x1a9   : > { %v534_v14 = vrot.slane %v533_v12, 1 }
 0x1aa   : > { %v529_v15 = vadd.f32 %v528_v13, %v527_v11 }
 0x1ab   : > { %v535_v16 = vadd.f32 %v534_v14, %v533_v12 }
 0x1ac   : > { %805 = vrcp.f32 %v529_v15 }
 0x1ad   : > { %807 = vrcp.f32 %v535_v16 }
 0x1b2   : > { %v806_v17 = vpop.eup %805 }
 0x1b3   : > { %v808_v18 = vpop.eup %807  ;;  %v538_v19 = vmul.f32 %v806_v17, %v802_v63 }
 0x1b4   : > { %v539_v20 = vmul.f32 %v808_v18, %v804_v0 }
 0x1b5   : > { %v540_v21 = vmul.f32 %v538_v19, %v891_v3  ;;  %v544_v22 = vmul.f32 %v538_v19, %v882_v1 }
 0x1b6   : > { %v541_v23 = vmul.f32 %v539_v20, %v893_v4  ;;  %v545_v24 = vmul.f32 %v539_v20, %v885_v2 }
 0x1b7   : > { %v768_v25 = vmul.f32 -1.442695, %v544_v22 }
 0x1b8   : > { %v542_v26 = vpack.c.bf16 %v541_v23, %v540_v21  ;;  %v769_v27 = vmul.f32 -1.442695, %v545_v24 }
 0x1b9   : > { %809 = vpow2.f32 %v768_v25 }
 0x1ba   : > { %543 = vst [vmem:[%s358_s25] sm:$0xff] %v542_v26  ;;  %811 = vpow2.f32 %v769_v27 }
 0x1bf   : > { %v810_v28 = vpop.eup %809 }
 0x1c0   : > { %v812_v29 = vpop.eup %811  ;;  %v552_v30 = vadd.f32 1.0, %v810_v28 }
 0x1c1   : > { %v553_v3 = vadd.f32 1.0, %v812_v29 }
 0x1c2   : > { %813 = vrcp.f32 %v552_v30  ;;  %v565_v33 = vand.u32 2147483648, %v552_v30  ;;  %v563_v36 = vand.u32 2147483647, %v552_v30  ;;  %vm559_vm11 = vweird.f32 %v552_v30 }
 0x1c3   : > { %815 = vrcp.f32 %v553_v3  ;;  %v580_v37 = vand.u32 2147483648, %v553_v3  ;;  %v578_v39 = vand.u32 2147483647, %v553_v3  ;;  %vm574_vm13 = vweird.f32 %v553_v3 }
 0x1c4   : > { %v566_v41 = vor.u32 1.1754944e-38, %v565_v33  ;;  %vm564_vm14 = vcmp.eq.f32.partialorder %v563_v36, 8.507059e+37 }
 0x1c5   : > { %v581_v44 = vor.u32 1.1754944e-38, %v580_v37  ;;  %vm579_vm0 = vcmp.eq.f32.partialorder %v578_v39, 8.507059e+37 }
 0x1c8   : > { %v814_v1 = vpop.eup %813 }
 0x1c9   : > { %v816_v4 = vpop.eup %815  ;;  %v555_v31 = vmul.f32 %v814_v1, %v552_v30  ;;  %vm560_vm9 = vweird.f32 %v814_v1 }
 0x1ca   : > { %v570_v2 = vmul.f32 %v816_v4, %v553_v3  ;;  %vm575_vm10 = vweird.f32 %v816_v4  ;;  %vm561_vm12 = vmor %vm559_vm11, %vm560_vm9 }
 0x1cb   : > { %v556_v32 = vsub.f32 1.0, %v555_v31  ;;  %vm576_vm15 = vmor %vm574_vm13, %vm575_vm10 }
 0x1cc   : > { %v571_v34 = vsub.f32 1.0, %v570_v2 }
 0x1cd   : > { %v557_v35 = vmul.f32 %v814_v1, %v556_v32 }
 0x1ce   : > { %v572_v38 = vmul.f32 %v816_v4, %v571_v34 }
 0x1cf   : > { %v558_v40 = vadd.f32 %v814_v1, %v557_v35 }
 0x1d0   : > { %v573_v42 = vadd.f32 %v816_v4, %v572_v38 }
 0x1d1   : > { %v562_v43 = vsel %vm561_vm12, %v814_v1, %v558_v40 }
 0x1d2   : > { %v567_v45 = vsel %vm564_vm14, %v566_v41, %v562_v43  ;;  %v577_v46 = vsel %vm576_vm15, %v816_v4, %v573_v42 }
 0x1d3   : > { %v582_v47 = vsel %vm579_vm0, %v581_v44, %v577_v46 }
 0x1d4   : > { %v584_v48 = vpack.c.bf16 %v582_v47, %v567_v45 }
 0x1d6   : > { %585 = vst [vmem:[%s363_s28] sm:$0xff] %v584_v48 }
 0x1d7 PF: > { %s18_s24 = sadd.s32 1, %s823_s24  }
 0x1d8   : > { %p15_p4 = scmp.ge.s32.totalorder %s18_s24, 4  }
 0x1da   :  { %17 = sbr.rel (!%p15_p4) target bundleno = 1 (0x1), region = 103 }

// kernel: mwi_forward.3
= control target key start
LH: loop header
LB: loop body
LE: loop exit
PB: predicated region body
PF: predicated region fallthrough
CT: control target
= control target key end

     0   :  { %s360_s12 = smov 0   ;;  %s383_s0 = inlined_call_operand.vmem [shape: bf16[2,8,256], index: 0, kind: input, shape index: {}]   ;;  %s384_s1 = inlined_call_operand.vmem [shape: bf16[2,8,256], index: 1, kind: input, shape index: {}]   ;;  %s385_s2 = inlined_call_operand.vmem [shape: bf16[2,8,256], index: 2, kind: input, shape index: {}]   ;;  %s386_s3 = inlined_call_operand.vmem [shape: f32[2,8,256], index: 3, kind: output, shape index: {}]  }
   0x1 LB: > { %s305_s13 = sadd.s32 4294967295, %s338_s12   ;;  %p309_p0 = scmp.ge.s32.totalorder %s338_s12, 1  ;;  %s338_s12 = sphi %s360_s12, %s13_s12  }
   0x2   : > { %p157_p1 = scmp.lt.s32.totalorder %s338_s12, 3 }
   0x4   : > { %p158_p2 = pnand %p309_p0, %p157_p1 }
   0x5   : > { %p191_p3 = scmp.lt.s32.totalorder (!%p158_p2), %s305_s13, 1 }
   0x6   : > { %161 = sbr.rel (%p158_p2) target bundleno = 24 (0x18), region = 32 }
   0xb   : > { %s388_s13 = smov (!%p191_p3, %s305_s13), 1 }
   0xc   : > { %s320_s14 = sshll.u32 %s388_s13, 3  ;;  %s323_s24 = sshll.u32 %s388_s13, 4 }
   0xd   : > { %s195_s17 = scalar_lea.vmem %s383_s0, %s320_s14  ;;  %s200_s20 = scalar_lea.vmem %s384_s1, %s320_s14 }
   0xe   : > { %s205_s23 = scalar_lea.vmem %s385_s2, %s320_s14  ;;  %v214_v0 = vld [vmem:[%s200_s20] sm:$0xff]  ;;  %s210_s27 = scalar_lea.vmem %s386_s3, %s323_s24 }
   0xf   : > { %v217_v1 = vld [vmem:[%s195_s17] sm:$0xff]  ;;  %v215_v3 = vunpack.c.l.bf16 %v214_v0  ;;  %v216_v5 = vunpack.c.h.bf16 %v214_v0 }
  0x10   : > { %v211_v2 = vld [vmem:[%s205_s23] sm:$0xff]  ;;  %v218_v4 = vunpack.c.l.bf16 %v217_v1  ;;  %v219_v6 = vunpack.c.h.bf16 %v217_v1 }
  0x11   : > { %v212_v7 = vunpack.c.l.bf16 %v211_v2  ;;  %v213_v8 = vunpack.c.h.bf16 %v211_v2 }
  0x12   : > { %v220_v9 = vadd.f32 %v218_v4, %v215_v3  ;;  %v221_v10 = vadd.f32 %v219_v6, %v216_v5 }
  0x14   : > { %v222_v11 = vmul.f32 %v220_v9, %v212_v7  ;;  %v223_v12 = vmul.f32 %v221_v10, %v213_v8 }
  0x16   : > { %224 = vst [vmem:[%s210_s27] sm:$0xff] %v222_v11 }
  0x17   : > { %225 = vst [vmem:[%s210_s27 + $0x8] sm:$0xff] %v223_v12 }
  0x18 PF: > { %s13_s12 = sadd.s32 1, %s338_s12  }
  0x19   : > { %p10_p4 = scmp.ge.s32.totalorder %s13_s12, 4  }
  0x1b   :  { %12 = sbr.rel (!%p10_p4) target bundleno = 1 (0x1), region = 68 }

</bundles_post_ra>
